<compile_context>
chip_gen: v5e
topology: v5e:2x2
jax: 0.10.0
libtpu: 0.0.40
codegen_flags: <defaults>
</compile_context>

<pallas_src>
import jax
import jax.numpy as jnp
from jax.experimental import pallas as pl
from jax.experimental.pallas import tpu as pltpu


def attention_kernel(kf_ref, q_ref, v_ref, w_ref, mask_ref, att_ref, e_ref):
    """One grid step == one tile of B_TILE batch elements.

    kf_ref   : VMEM (B_TILE*T, D) bf16   k rows, batch-flattened
    q_ref    : VMEM (B_TILE, D)   bf16
    v_ref    : VMEM (B_TILE, T, D) bf16
    w_ref    : VMEM (D, P)        bf16   k_proj weight, pre-transposed (shared)
    mask_ref : VMEM (B_TILE, T)   f32    additive mask: 0 valid, -1e30 padded
    att_ref  : VMEM (B_TILE, P)   f32
    e_ref    : VMEM (B_TILE, T)   f32    lane-dense attention weights
    """
    b_tile, t = e_ref.shape
    w = w_ref[...]                                                        # (D, P)

    # Fused projections: one MXU matmul for all B_TILE*T key rows, one for the
    # B_TILE query rows.  bf16 operands, f32 accumulation.
    enc_k = jnp.dot(kf_ref[...], w, preferred_element_type=jnp.float32)   # (B_TILE*T, P)
    enc_q = jnp.dot(q_ref[...], w, preferred_element_type=jnp.float32)    # (B_TILE, P)

    # Lane-dense alignment scores: key-time axis on lanes.
    # (T is a multiple of 8 in the example, so this reshape is layout-preserving.)
    enc_k3 = enc_k.reshape(b_tile, t, -1)                                 # (B_TILE, T, P)
    scores = jnp.einsum(
        "bup,btp->but", enc_q[:, None, :], enc_k3,
        preferred_element_type=jnp.float32)[:, 0, :]                      # (B_TILE, T)
    scores = scores + mask_ref[...]                                       # length masking

    # Masked softmax over the key-time (lane) axis, f32.
    m = jnp.max(scores, axis=-1, keepdims=True)
    p = jnp.exp(scores - m)
    denom = jnp.sum(p, axis=-1, keepdims=True)
    e = p * pl.reciprocal(denom, approx=True)                             # (B_TILE, T)
    e_ref[...] = e

    # Value path reordered: context = E^T V  (B_TILE, D), then attended = context @ W^T.
    # Exactly equal to E^T (V W^T) but drops the T*D*P enc_v projection.
    ctx = jnp.einsum(
        "but,btd->bud", e[:, None, :].astype(v_ref.dtype), v_ref[...],
        preferred_element_type=jnp.float32)[:, 0, :]                      # (B_TILE, D)
    att_ref[...] = jnp.dot(ctx.astype(w.dtype), w,
                           preferred_element_type=jnp.float32)            # (B_TILE, P)


def _pick_b_tile(B, T, D, itemsize=2, vmem_budget=8 << 20):
    """Largest batch tile that divides B, is a multiple of 8 (sublane granularity),
    keeps double-buffered k+v input tiles under a conservative VMEM budget, and
    (when possible) leaves >= 2 grid steps so both v7x TensorCores get work."""
    def tile_bytes(bt):
        return 2 * 2 * (bt * T * D * itemsize)   # k tile + v tile, double-buffered
    cands = [c for c in range(8, B + 1, 8)
             if B % c == 0 and tile_bytes(c) <= vmem_budget]
    if not cands:
        return B                                  # full-batch block is always legal
    multi_step = [c for c in cands if B // c >= 2]
    return max(multi_step) if multi_step else max(cands)


def attention_forward(k, q, v, k_lens, w):
    B, T, D = k.shape
    P = w.shape[0]
    b_tile = _pick_b_tile(B, T, D)
    grid = (B // b_tile,)

    compute_dtype = jnp.bfloat16
    k_flat = k.reshape(B * T, D).astype(compute_dtype)   # free XLA reshape + cast
    q_c = q.astype(compute_dtype)
    v_c = v.astype(compute_dtype)
    w_dp = w.T.astype(compute_dtype)                     # (D, P), transposed ONCE here
    add_mask = jnp.where(
        jnp.arange(T, dtype=jnp.int32)[None, :] < k_lens[:, None],
        0.0, -1e30).astype(jnp.float32)                  # (B, T) lane-dense additive mask

    grid_spec = pltpu.PrefetchScalarGridSpec(
        num_scalar_prefetch=0,
        grid=grid,
        in_specs=[
            pl.BlockSpec((b_tile * T, D), lambda i: (i, 0)),     # k (batch-flattened)
            pl.BlockSpec((b_tile, D),     lambda i: (i, 0)),     # q
            pl.BlockSpec((b_tile, T, D),  lambda i: (i, 0, 0)),  # v
            pl.BlockSpec((D, P),          lambda i: (0, 0)),     # W^T (shared, not re-DMA'd)
            pl.BlockSpec((b_tile, T),     lambda i: (i, 0)),     # additive length mask
        ],
        out_specs=[
            pl.BlockSpec((b_tile, P), lambda i: (i, 0)),         # attended
            pl.BlockSpec((b_tile, T), lambda i: (i, 0)),         # E (lane-dense)
        ],
    )

    attended, e = pl.pallas_call(
        attention_kernel,
        out_shape=(
            jax.ShapeDtypeStruct((B, P), jnp.float32),
            jax.ShapeDtypeStruct((B, T), jnp.float32),
        ),
        grid_spec=grid_spec,
        compiler_params=pltpu.CompilerParams(
            dimension_semantics=("parallel",)),
    )(k_flat, q_c, v_c, w_dp, add_mask)

    # Callers expect E as (B, T, 1) like the torch module.
    return attended, e[..., None]


def attention_reference(k, q, v, k_lens, w):
    """Plain-JAX f32 reference of the torch forward (eval mode)."""
    enc_k = k @ w.T                      # (B, T, P)
    enc_q = (q @ w.T)[:, None, :]        # (B, 1, P)
    enc_v = v @ w.T                      # (B, T, P)
    scores = jnp.einsum("btp,bup->btu", enc_k, enc_q)            # (B, T, 1)
    mask = (jnp.arange(k.shape[1])[None, :] < k_lens[:, None])[:, :, None]
    scores = jnp.where(mask, scores, -1e30)
    E = jax.nn.softmax(scores, axis=1)                           # (B, T, 1)
    attended = jnp.einsum("btp,btu->bp", enc_v, E)               # (B, P)
    return attended, E


if __name__ == "__main__":
    B, T, D, P = 16, 8, 32, 32

    key = jax.random.PRNGKey(0)
    kk, kq, kv, kw, kl = jax.random.split(key, 5)
    k = jax.random.normal(kk, (B, T, D), dtype=jnp.float32)
    q = jax.random.normal(kq, (B, D), dtype=jnp.float32)
    v = jax.random.normal(kv, (B, T, D), dtype=jnp.float32)
    # deterministic Linear weight (proj_dim x input_dim), no bias
    w = (jax.random.normal(kw, (P, D), dtype=jnp.float32) * 0.05)
    # varied key lengths, at least one full and some short
    k_lens = jax.random.randint(kl, (B,), 1, T + 1).astype(jnp.int32)
    k_lens = k_lens.at[0].set(T)

    attended, E = attention_forward(k, q, v, k_lens, w)
    attended = jax.block_until_ready(attended)
    E = jax.block_until_ready(E)

    ref_att, ref_E = attention_reference(k, q, v, k_lens, w)

    # bf16 MXU operands with f32 accumulation -> compare against the f32
    # reference at bf16-level tolerance; softmax rows must still sum to ~1.
    assert jnp.allclose(attended, ref_att, atol=2e-2, rtol=2e-2)
    assert jnp.allclose(E, ref_E, atol=2e-2, rtol=2e-2)
    assert jnp.allclose(jnp.sum(E[:, :, 0], axis=-1), 1.0, atol=1e-2)

    print("KERNEL_OK")
</pallas_src>

<mosaic_0001>
module attributes {stable_mosaic.version = 11 : i64} {
  func.func @attention_kernel(%arg0: i32, %arg1: memref<64x32xbf16, #tpu.memory_space<vmem>>, %arg2: memref<8x32xbf16, #tpu.memory_space<vmem>>, %arg3: memref<8x8x32xbf16, #tpu.memory_space<vmem>>, %arg4: memref<32x32xbf16, #tpu.memory_space<vmem>>, %arg5: memref<8x8xf32, #tpu.memory_space<vmem>>, %arg6: memref<8x32xf32, #tpu.memory_space<vmem>>, %arg7: memref<8x8xf32, #tpu.memory_space<vmem>>) attributes {dimension_semantics = [#tpu.dimension_semantics<parallel>], iteration_bounds = array<i64: 2>, scalar_prefetch = 0 : i64, scratch_operands = 0 : i64, tpu.core_type = #tpu.core_type<tc>, window_params = [{transform_indices = @transform_0, window_bounds = array<i64: 64, 32>}, {transform_indices = @transform_1, window_bounds = array<i64: 8, 32>}, {transform_indices = @transform_2, window_bounds = array<i64: 8, 8, 32>}, {pipeline_mode = #tpu.pipeline_mode<synchronous>, transform_indices = @transform_3, window_bounds = array<i64: 32, 32>}, {transform_indices = @transform_4, window_bounds = array<i64: 8, 8>}, {transform_indices = @transform_5, window_bounds = array<i64: 8, 32>}, {transform_indices = @transform_6, window_bounds = array<i64: 8, 8>}]} {
    %c0 = arith.constant 0 : index
    %c0_0 = arith.constant 0 : index
    %0 = vector.load %arg4[%c0, %c0_0] : memref<32x32xbf16, #tpu.memory_space<vmem>>, vector<32x32xbf16>
    %c0_1 = arith.constant 0 : index
    %c0_2 = arith.constant 0 : index
    %1 = vector.load %arg1[%c0_1, %c0_2] : memref<64x32xbf16, #tpu.memory_space<vmem>>, vector<64x32xbf16>
    %cst = arith.constant dense<0.000000e+00> : vector<64x32xf32>
    %2 = tpu.matmul %1, %0, %cst {dimension_numbers = #tpu.dot_dimension_numbers<[1], [0], [0], [1], [0, 0, 1, 1], [], []>} : vector<64x32xbf16>, vector<32x32xbf16>, vector<64x32xf32> -> vector<64x32xf32>
    %c0_3 = arith.constant 0 : index
    %c0_4 = arith.constant 0 : index
    %3 = vector.load %arg2[%c0_3, %c0_4] : memref<8x32xbf16, #tpu.memory_space<vmem>>, vector<8x32xbf16>
    %cst_5 = arith.constant dense<0.000000e+00> : vector<8x32xf32>
    %4 = tpu.matmul %3, %0, %cst_5 {dimension_numbers = #tpu.dot_dimension_numbers<[1], [0], [0], [1], [0, 0, 1, 1], [], []>} : vector<8x32xbf16>, vector<32x32xbf16>, vector<8x32xf32> -> vector<8x32xf32>
    %5 = vector.shape_cast %2 : vector<64x32xf32> to vector<8x8x32xf32>
    %6 = vector.shape_cast %4 : vector<8x32xf32> to vector<8x1x32xf32>
    "tpu.trace_start"() <{level = 10 : i32, message = "bup,btp->but"}> : () -> ()
    %cst_6 = arith.constant dense<0.000000e+00> : vector<8x1x8xf32>
    %7 = tpu.matmul %6, %5, %cst_6 {dimension_numbers = #tpu.dot_dimension_numbers<[2], [2], [1], [1], [0, 0, 0, 1, 1, 1], [0], [0]>} : vector<8x1x32xf32>, vector<8x8x32xf32>, vector<8x1x8xf32> -> vector<8x1x8xf32>
    "tpu.trace_stop"() : () -> ()
    %8 = vector.shape_cast %7 : vector<8x1x8xf32> to vector<8x8xf32>
    %c0_7 = arith.constant 0 : index
    %c0_8 = arith.constant 0 : index
    %9 = vector.load %arg5[%c0_7, %c0_8] : memref<8x8xf32, #tpu.memory_space<vmem>>, vector<8x8xf32>
    %10 = arith.addf %8, %9 : vector<8x8xf32>
    %cst_9 = arith.constant dense<0xFF800000> : vector<8xf32>
    %11 = vector.multi_reduction <maximumf>, %10, %cst_9 [1] : vector<8x8xf32> to vector<8xf32>
    %12 = vector.shape_cast %11 : vector<8xf32> to vector<8x1xf32>
    %13 = vector.broadcast %12 : vector<8x1xf32> to vector<8x8xf32>
    %14 = arith.subf %10, %13 : vector<8x8xf32>
    %15 = math.exp %14 : vector<8x8xf32>
    %cst_10 = arith.constant dense<0.000000e+00> : vector<8xf32>
    %16 = vector.multi_reduction <add>, %15, %cst_10 [1] : vector<8x8xf32> to vector<8xf32>
    %17 = vector.shape_cast %16 : vector<8xf32> to vector<8x1xf32>
    %18 = tpu.reciprocal %17 {approx = true} : vector<8x1xf32> -> vector<8x1xf32>
    %19 = vector.broadcast %18 : vector<8x1xf32> to vector<8x8xf32>
    %20 = arith.mulf %15, %19 : vector<8x8xf32>
    %c0_11 = arith.constant 0 : index
    %c0_12 = arith.constant 0 : index
    %21 = vector.load %arg7[%c0_11, %c0_12] : memref<8x8xf32, #tpu.memory_space<vmem>>, vector<8x8xf32>
    tpu.vector_store %arg7[%c0_11, %c0_12], %20 {strides = array<i32>} : memref<8x8xf32, #tpu.memory_space<vmem>>, vector<8x8xf32>,
    %22 = vector.shape_cast %20 : vector<8x8xf32> to vector<8x1x8xf32>
    %23 = arith.truncf %22 : vector<8x1x8xf32> to vector<8x1x8xbf16>
    %c0_13 = arith.constant 0 : index
    %c0_14 = arith.constant 0 : index
    %c0_15 = arith.constant 0 : index
    %24 = vector.load %arg3[%c0_13, %c0_14, %c0_15] : memref<8x8x32xbf16, #tpu.memory_space<vmem>>, vector<8x8x32xbf16>
    "tpu.trace_start"() <{level = 10 : i32, message = "but,btd->bud"}> : () -> ()
    %cst_16 = arith.constant dense<0.000000e+00> : vector<8x1x32xf32>
    %25 = tpu.matmul %23, %24, %cst_16 {dimension_numbers = #tpu.dot_dimension_numbers<[2], [1], [1], [2], [0, 0, 0, 1, 1, 2], [0], [0]>} : vector<8x1x8xbf16>, vector<8x8x32xbf16>, vector<8x1x32xf32> -> vector<8x1x32xf32>
    "tpu.trace_stop"() : () -> ()
    %26 = vector.shape_cast %25 : vector<8x1x32xf32> to vector<8x32xf32>
    %27 = arith.truncf %26 : vector<8x32xf32> to vector<8x32xbf16>
    %cst_17 = arith.constant dense<0.000000e+00> : vector<8x32xf32>
    %28 = tpu.matmul %27, %0, %cst_17 {dimension_numbers = #tpu.dot_dimension_numbers<[1], [0], [0], [1], [0, 0, 1, 1], [], []>} : vector<8x32xbf16>, vector<32x32xbf16>, vector<8x32xf32> -> vector<8x32xf32>
    %c0_18 = arith.constant 0 : index
    %c0_19 = arith.constant 0 : index
    %29 = vector.load %arg6[%c0_18, %c0_19] : memref<8x32xf32, #tpu.memory_space<vmem>>, vector<8x32xf32>
    tpu.vector_store %arg6[%c0_18, %c0_19], %28 {strides = array<i32>} : memref<8x32xf32, #tpu.memory_space<vmem>>, vector<8x32xf32>,
    return
  }
  func.func @transform_0(%arg0: i32) -> (i32, i32) {
    %c0_i32 = arith.constant 0 : i32
    %c0_i32_0 = arith.constant 0 : i32
    return %arg0, %c0_i32 : i32, i32
  }
  func.func @transform_1(%arg0: i32) -> (i32, i32) {
    %c0_i32 = arith.constant 0 : i32
    %c0_i32_0 = arith.constant 0 : i32
    return %arg0, %c0_i32 : i32, i32
  }
  func.func @transform_2(%arg0: i32) -> (i32, i32, i32) {
    %c0_i32 = arith.constant 0 : i32
    %c0_i32_0 = arith.constant 0 : i32
    %c0_i32_1 = arith.constant 0 : i32
    return %arg0, %c0_i32, %c0_i32_0 : i32, i32, i32
  }
  func.func @transform_3(%arg0: i32) -> (i32, i32) {
    %c0_i32 = arith.constant 0 : i32
    %c0_i32_0 = arith.constant 0 : i32
    %c0_i32_1 = arith.constant 0 : i32
    return %c0_i32, %c0_i32_0 : i32, i32
  }
  func.func @transform_4(%arg0: i32) -> (i32, i32) {
    %c0_i32 = arith.constant 0 : i32
    %c0_i32_0 = arith.constant 0 : i32
    return %arg0, %c0_i32 : i32, i32
  }
  func.func @transform_5(%arg0: i32) -> (i32, i32) {
    %c0_i32 = arith.constant 0 : i32
    %c0_i32_0 = arith.constant 0 : i32
    return %arg0, %c0_i32 : i32, i32
  }
  func.func @transform_6(%arg0: i32) -> (i32, i32) {
    %c0_i32 = arith.constant 0 : i32
    %c0_i32_0 = arith.constant 0 : i32
    return %arg0, %c0_i32 : i32, i32
  }
}

</mosaic_0001>

<bundles_post_ra>
// kernel: tpu_custom_call.1
= control target key start
LH: loop header
LB: loop body
LE: loop exit
PB: predicated region body
PF: predicated region fallthrough
CT: control target
= control target key end

     0   :  { %12 = vsyncpa [#allocation3], 0  ;;  %s1601_s0 = inlined_call_operand.vmem [shape: bf16[128,32], index: 0, kind: input, shape index: {}]   ;;  %s1602_s1 = inlined_call_operand.vmem [shape: bf16[16,32], index: 1, kind: input, shape index: {}]   ;;  %s1603_s2 = inlined_call_operand.vmem [shape: bf16[16,8,32], index: 2, kind: input, shape index: {}]   ;;  %s1604_s3 = inlined_call_operand.vmem [shape: bf16[32,32], index: 3, kind: input, shape index: {}]   ;;  %s1605_s4 = inlined_call_operand.vmem [shape: f32[16,8], index: 4, kind: input, shape index: {}]   ;;  %s1606_s5 = inlined_call_operand.hbm [shape: f32[16,32], index: 5, kind: output, shape index: {0}]   ;;  %s1607_s6 = inlined_call_operand.vmem [shape: f32[16,8], index: 6, kind: output, shape index: {1}]  }
   0x1   :  { %14 = vsyncpa [#allocation3 + $0x1], 0  ;;  %s1404_s21 = smov 0   ;;  %s1406_s22 = smov 0  }
   0x2   :  { %s1408_s23 = smov 0   ;;  %s1410_s24 = smov 0  }
   0x3 LB: > { %s1171_s25 = sadd.s32 4294967295, %s1367_s24   ;;  %s1172_s26 = sadd.s32 4294967294, %s1367_s24   ;;  %s1367_s24 = sphi %s1410_s24, %s1613_s24   ;;  %s1363_s23 = sphi %s1408_s23, %s1612_s23   ;;  %s1359_s22 = sphi %s1406_s22, %s1611_s22   ;;  %s1355_s21 = sphi %s1404_s21, %s1610_s21  }
   0x4   : > { %s1427_s27 = sadd.s32 1, %s1367_s24   ;;  %s152_s28 = sadd.s32 1, %s1363_s23 }
   0x5   : > { %s149_s29 = ssub.s32 %s1367_s24, %s1427_s27  ;;  %p162_p0 = scmp.ne.s32.totalorder %s1363_s23, %s1359_s22 }
   0x6   : > { %p150_p1 = scmp.eq.s32.totalorder %s149_s29, 0  ;;  %p163_p2 = scmp.eq.s32.totalorder %s1171_s25, 1 }
   0x7   : > { %p168_p3 = scmp.ne.s32.totalorder %s1359_s22, %s1355_s21  ;;  %p169_p4 = scmp.eq.s32.totalorder %s1172_s26, 1 }
   0x8   : > { %s1437_s30 = scalar_select %p150_p1, %s1363_s23, %s152_s28  }
   0x9   : > { %p1439_p5 = por %p163_p2, %p162_p0  ;;  %p1443_p6 = por %p169_p4, %p168_p3 }
   0xa   : > { %p1175_p7 = scmp.ge.s32.totalorder %s1367_s24, 1  ;;  %p248_p8 = scmp.lt.s32.totalorder %s1367_s24, 3 }
   0xc   : > { %p249_p9 = pnand %p1175_p7, %p248_p8 }
   0xd   : > { %s1454_s11 = sshll.u32 (!%p249_p9), %s1171_s25, 3  ;;  %p301_p10 = scmp.lt.s32.totalorder (!%p249_p9), %s1171_s25, 1 }
   0xe   : > { %252 = sbr.rel (%p249_p9) target bundleno = 930 (0x3a2), region = 40  ;;  %p296_p11 = scmp.lt.s32.totalorder (!%p249_p9), %s1454_s11, 15 }
  0x13   : > { %v1452_v0 = vld [vmem:[%s1604_s3 + $0x8] sm:$0xff]  ;;  %v1461_v1 = vld [vmem:[%s1604_s3] sm:$0xff]  ;;  %s1615_s25 = smov (!%p301_p10, %s1171_s25), 1  ;;  %vm364_vm0 = vcmask 261120   ;;  %vm665_vm1 = vcmask 1041409   ;;  %vm668_vm2 = vcmask 1042434  }
  0x14   : > { %383 = vmatpush.bf16.msra.mxu0 %v1452_v0  ;;  %416 = vmatpush.bf16.msra.mxu1 %v1452_v0  ;;  %s1467_s14 = scalar_select %p296_p11, %s1454_s11, 15  ;;  %vm671_vm3 = vcmask 1043459   ;;  %vm674_vm4 = vcmask 1044484   ;;  %vm677_vm5 = vcmask 1045509   ;;  %vm680_vm6 = vcmask 1046534  }
  0x15   : > { %s1179_s15 = sshll.u32 %s1615_s25, 2  ;;  %s1182_s29 = sshll.u32 %s1615_s25, 3  ;;  %vm683_vm7 = vcmask 1047559   ;;  %vm686_vm8 = vcmask 64512   ;;  %vm824_vm9 = vcmask 1043456  }
  0x16   : > { %s1178_s16 = sshll.u32 %s1467_s14, 2  ;;  %s304_s19 = scalar_lea.vmem %s1602_s1, %s1179_s15 }
  0x17   : > { %s299_s28 = scalar_lea.vmem %s1601_s0, %s1178_s16  ;;  %v406_v2 = vld [vmem:[%s304_s19] sm:$0xf]  ;;  %s314_s12 = scalar_lea.vmem %s1605_s4, %s1182_s29 }
  0x18   : > { %384 = vmatpush.bf16.msra.mxu0 %v1461_v1  ;;  %417 = vmatpush.bf16.msra.mxu1 %v1461_v1  ;;  %v1244_v3 = vld [vmem:[%s299_s28] sm:$0xff]  ;;  %v1245_v4 = vld [vmem:[%s299_s28 + $0x8] sm:$0xff]  ;;  %v1246_v5 = vld [vmem:[%s299_s28 + $0x10] sm:$0xff]  ;;  %s309_s17 = scalar_lea.vmem %s1603_s2, %s1178_s16  ;;  %s318_s18 = scalar_lea.vmem %s1607_s6, %s1182_s29 }
  0x19   : > { %v1247_v6 = vld [vmem:[%s299_s28 + $0x18] sm:$0xff]  ;;  %v631_v25 = vld [vmem:[%s314_s12] sm:$0xff]  ;;  %s286_s25 = sand.u32 1, %s1359_s22   ;;  %s1045_s28 = scalar_lea.hbm %s1606_s5, %s1454_s11 }
  0x1a   : > { %v633_v26 = vrot.slane %v631_v25, 1  ;;  %v634_v28 = vrot.slane %v631_v25, 2  ;;  %v635_v32 = vrot.slane %v631_v25, 3  ;;  %v636_v36 = vrot.slane %v631_v25, 4  ;;  %s1176_s19 = sshll.u32 %s286_s25, 3  ;;  %s1049_s10 = sshll.u32 %s1045_s28, 4  ;;  %s1050_s10 = int_to_ptr.hbm [resolvable:$true] %s1049_s10 }
  0x1b   : > { %1208 = vmatmul.msk.bf16.vlgmr.msra.gmra.mxu0 %vm364_vm0, %v1244_v3  ;;  %1212 = vmatmul.msk.bf16.vlgmr.msra.gmra.mxu1 %vm364_vm0, %v406_v2  ;;  %v637_v39 = vrot.slane %v631_v25, 5  ;;  %v638_v44 = vrot.slane %v631_v25, 6  ;;  %v639_v53 = vrot.slane %v631_v25, 7  ;;  %s288_s29 = scalar_lea.vmem [#allocation2], %s1176_s19  ;;  %s1031_s12 = scalar_lea.sflag [#allocation3], %s286_s25 }
  0x1c   : > { %s1047_s9 = sshll.u32 %s288_s29, 4  ;;  %s1319_s13 = sshra.s32 %s1050_s10, 4  ;;  %s1048_s9 = int_to_ptr.vmem [resolvable:$true] %s1047_s9  ;;  %s1320_s13 = int_to_ptr.hbm [resolvable:$true] %s1319_s13 }
  0x1d   : > { %s1321_s15 = scalar_lea.hbm %s1320_s13, 8  ;;  %s1325_s11 = scalar_lea.hbm %s1606_s5, 16 }
  0x1e   : > { %p1322_p12 = scmp.ne.s32.totalorder %s1320_s13, %s1321_s15  ;;  %p1326_p1 = scmp.lt.s32.totalorder %s1320_s13, %s1606_s5 }
  0x1f   : > { %p1327_p2 = scmp.lt.s32.totalorder %s1325_s11, %s1321_s15 }
  0x20   : > { %p1323_p13 = pnand %p1322_p12, %p1439_p5 }
  0x21   : > { %p1328_p3 = por %p1327_p2, %p1326_p1 }
  0x22   : > { %p1324_p0 = pneg %p1323_p13 }
  0x24   : > { %p1329_p4 = pnand %p1328_p3, %p1324_p0 }
  0x2b   : > { %1209 = vmatmul.msk.bf16.gmra.mxu0 %vm364_vm0, %v1245_v4 }
  0x3b   : > { %1210 = vmatmul.msk.bf16.gmra.mxu0 %vm364_vm0, %v1246_v5 }
  0x4b   : > { %1211 = vmatmul.msk.bf16.gmra.mxu0 %vm364_vm0, %v1247_v6 }
  0x98   : > { %v386_v7 = vpop.f32.mrf.mxu0  ;;  %v419_v8 = vpop.f32.mrf.mxu1 }
  0x99   : > { %1213 = vmatpush.xpose.msk.msrb.mxu0 %vm364_vm0, %v386_v7  ;;  %v424_v10 = vrot.slane %v419_v8, 1  ;;  %v425_v13 = vrot.slane %v419_v8, 2  ;;  %v426_v15 = vrot.slane %v419_v8, 3  ;;  %v427_v17 = vrot.slane %v419_v8, 4 }
  0x9a   : > { %v428_v19 = vrot.slane %v419_v8, 5  ;;  %v429_v21 = vrot.slane %v419_v8, 6  ;;  %v430_v23 = vrot.slane %v419_v8, 7 }
  0x9c   : > { %1214 = vmatmul.msk.f32.vlgmr.msrb.gmra.mxu0 %vm364_vm0, %v419_v8 }
  0xa0   : > { %v388_v9 = vpop.f32.mrf.mxu0  ;;  %v421_v11 = vpop.f32.mrf.mxu1 }
  0xa1   : > { %1215 = vmatpush.xpose.msk.msra.mxu3 %vm364_vm0, %v388_v9 }
  0xa4   : > { %1216 = vmatmul.msk.f32.vlgmr.msra.gmra.mxu3 %vm364_vm0, %v424_v10 }
  0xa8   : > { %v391_v12 = vpop.f32.mrf.mxu0 }
  0xa9   : > { %1217 = vmatpush.xpose.msk.msra.mxu2 %vm364_vm0, %v391_v12 }
  0xac   : > { %1218 = vmatmul.msk.f32.vlgmr.msra.gmra.mxu2 %vm364_vm0, %v425_v13 }
  0xb0   : > { %v393_v14 = vpop.f32.mrf.mxu0 }
  0xb1   : > { %1219 = vmatpush.xpose.msk.msrb.mxu3 %vm364_vm0, %v393_v14 }
  0xb4   : > { %1220 = vmatmul.msk.f32.vlgmr.msrb.gmra.mxu3 %vm364_vm0, %v426_v15 }
  0xb8   : > { %v396_v16 = vpop.f32.mrf.mxu0 }
  0xb9   : > { %1221 = vmatpush.xpose.msk.msrb.mxu2 %vm364_vm0, %v396_v16 }
  0xbc   : > { %1222 = vmatmul.msk.f32.vlgmr.msrb.gmra.mxu2 %vm364_vm0, %v427_v17 }
  0xc0   : > { %v398_v18 = vpop.f32.mrf.mxu0 }
  0xc1   : > { %1223 = vmatpush.xpose.msk.msra.mxu3 %vm364_vm0, %v398_v18 }
  0xc4   : > { %1224 = vmatmul.msk.f32.vlgmr.msra.gmra.mxu3 %vm364_vm0, %v428_v19 }
  0xc8   : > { %v401_v20 = vpop.f32.mrf.mxu0 }
  0xc9   : > { %1225 = vmatpush.xpose.msk.msrb.mxu1 %vm364_vm0, %v401_v20 }
  0xcc   : > { %1226 = vmatmul.msk.f32.vlgmr.msrb.gmra.mxu1 %vm364_vm0, %v429_v21 }
  0xd0   : > { %v403_v22 = vpop.f32.mrf.mxu0 }
  0xd1   : > { %1227 = vmatpush.xpose.msk.msra.mxu2 %vm364_vm0, %v403_v22 }
  0xd4   : > { %1228 = vmatmul.msk.f32.vlgmr.msra.gmra.mxu2 %vm364_vm0, %v430_v23 }
 0x119   : > { %v453_v31 = vpop.f32.mrf.mxu0 }
 0x11a   : > { %v648_v35 = vadd.f32 %v631_v25, %v453_v31 }
 0x127   : > { %v478_v24 = vpop.f32.mrf.mxu3 }
 0x128   : > { %v649_v30 = vadd.f32 %v633_v26, %v478_v24 }
 0x12a   : > { %v664_v34 = vrot.slane %v649_v30, 7 }
 0x12c   : > { %v666_v42 = vsel %vm665_vm1, %v664_v34, %v648_v35 }
 0x12f   : > { %v503_v27 = vpop.f32.mrf.mxu2 }
 0x130   : > { %v650_v33 = vadd.f32 %v634_v28, %v503_v27 }
 0x132   : > { %v667_v40 = vrot.slane %v650_v33, 6 }
 0x134   : > { %v669_v48 = vsel %vm668_vm2, %v667_v40, %v666_v42 }
 0x137   : > { %v528_v29 = vpop.f32.mrf.mxu3 }
 0x138   : > { %v651_v37 = vadd.f32 %v635_v32, %v528_v29 }
 0x13a   : > { %v670_v45 = vrot.slane %v651_v37, 5 }
 0x13c   : > { %v672_v51 = vsel %vm671_vm3, %v670_v45, %v669_v48  ;;  %v813_v48 = vld [vmem:[%s309_s17] sm:$0xf] }
 0x13f   : > { %v553_v38 = vpop.f32.mrf.mxu2 }
 0x140   : > { %v652_v43 = vadd.f32 %v636_v36, %v553_v38 }
 0x142   : > { %v673_v49 = vrot.slane %v652_v43, 4 }
 0x144   : > { %v675_v54 = vsel %vm674_vm4, %v673_v49, %v672_v51  ;;  %v814_v49 = vld [vmem:[%s309_s17 + $0x4] sm:$0xf] }
 0x145   : > { %v845_v51 = vsel %vm824_vm9, %v814_v49, 0 }
 0x146   : > { %854 = vmatpush.bf16.msra.mxu1 %v845_v51 }
 0x147   : > { %v578_v41 = vpop.f32.mrf.mxu3 }
 0x148   : > { %v653_v46 = vadd.f32 %v637_v39, %v578_v41 }
 0x149   : > { %v603_v47 = vpop.f32.mrf.mxu1 }
 0x14a   : > { %v654_v50 = vadd.f32 %v638_v44, %v603_v47  ;;  %v676_v52 = vrot.slane %v653_v46, 3 }
 0x14c   : > { %v679_v55 = vrot.slane %v654_v50, 2  ;;  %v678_v58 = vsel %vm677_vm5, %v676_v52, %v675_v54  ;;  %v815_v52 = vld [vmem:[%s309_s17 + $0x8] sm:$0xf]  ;;  %v816_v54 = vld [vmem:[%s309_s17 + $0xc] sm:$0xf] }
 0x14e   : > { %v681_v60 = vsel %vm680_vm6, %v679_v55, %v678_v58  ;;  %v817_v55 = vld [vmem:[%s309_s17 + $0x10] sm:$0xf] }
 0x14f   : > { %v902_v58 = vsel %vm824_vm9, %v817_v55, 0 }
 0x150   : > { %911 = vmatpush.bf16.msrb.mxu1 %v902_v58 }
 0x157   : > { %v628_v56 = vpop.f32.mrf.mxu2 }
 0x158   : > { %v655_v57 = vadd.f32 %v639_v53, %v628_v56  ;;  %v864_v53 = vsel %vm824_vm9, %v815_v52, 0  ;;  %v818_v56 = vld [vmem:[%s309_s17 + $0x14] sm:$0xf] }
 0x159   : > { %873 = vmatpush.bf16.msrb.mxu2 %v864_v53 }
 0x15a   : > { %v682_v59 = vrot.slane %v655_v57, 1 }
 0x15c   : > { %v684_v61 = vsel %vm683_vm7, %v682_v59, %v681_v60  ;;  %v921_v59 = vsel %vm824_vm9, %v818_v56, 0 }
 0x15d   : > { %v687_v62 = vsel %vm686_vm8, %v684_v61, -inf  ;;  %930 = vmatpush.bf16.msra.mxu2 %v921_v59  ;;  %v819_v61 = vld [vmem:[%s309_s17 + $0x18] sm:$0xf] }
 0x15e   : > { %688 = vmax.xlane.f32.xlu0 %v687_v62 }
 0x1d1   : > { %v689_v63 = vpop.xlane.xlu0 %688 }
 0x1d2   : > { %v691_v2 = vrot.slane %v689_v63, 1  ;;  %v692_v3 = vrot.slane %v689_v63, 2  ;;  %v693_v4 = vrot.slane %v689_v63, 3  ;;  %v694_v5 = vrot.slane %v689_v63, 4 }
 0x1d3   : > { %v695_v6 = vrot.slane %v689_v63, 5  ;;  %v706_v7 = vsub.f32 %v648_v35, %v689_v63  ;;  %v696_v8 = vrot.slane %v689_v63, 6  ;;  %v697_v9 = vrot.slane %v689_v63, 7 }
 0x1d4   : > { %v707_v10 = vsub.f32 %v649_v30, %v691_v2  ;;  %v708_v11 = vsub.f32 %v650_v33, %v692_v3  ;;  %v709_v12 = vsub.f32 %v651_v37, %v693_v4  ;;  %v710_v13 = vsub.f32 %v652_v43, %v694_v5 }
 0x1d5   : > { %v714_v14 = vmul.f32 1.442695, %v706_v7  ;;  %v711_v15 = vsub.f32 %v653_v46, %v695_v6  ;;  %v712_v16 = vsub.f32 %v654_v50, %v696_v8  ;;  %v713_v20 = vsub.f32 %v655_v57, %v697_v9  ;;  %v820_v6 = vld [vmem:[%s309_s17 + $0x1c] sm:$0xf] }
 0x1d6   : > { %v716_v17 = vmul.f32 1.442695, %v707_v10  ;;  %v718_v18 = vmul.f32 1.442695, %v708_v11  ;;  %v720_v19 = vmul.f32 1.442695, %v709_v12 }
 0x1d7   : > { %1287 = vpow2.f32 %v714_v14  ;;  %v722_v21 = vmul.f32 1.442695, %v710_v13  ;;  %v724_v22 = vmul.f32 1.442695, %v711_v15  ;;  %v726_v23 = vmul.f32 1.442695, %v712_v16 }
 0x1d8   : > { %1289 = vpow2.f32 %v716_v17  ;;  %v728_v24 = vmul.f32 1.442695, %v713_v20  ;;  %v826_v50 = vsel %vm824_vm9, %v813_v48, 0  ;;  %v883_v57 = vsel %vm824_vm9, %v816_v54, 0 }
 0x1d9   : > { %1291 = vpow2.f32 %v718_v18  ;;  %835 = vmatpush.bf16.msrb.mxu3 %v826_v50  ;;  %v940_v63 = vsel %vm824_vm9, %v819_v61, 0  ;;  %v959_v17 = vsel %vm824_vm9, %v820_v6, 0 }
 0x1da   : > { %1293 = vpow2.f32 %v720_v19 }
 0x1db   : > { %1295 = vpow2.f32 %v722_v21 }
 0x1dc   : > { %1297 = vpow2.f32 %v724_v22 }
 0x1dd   : > { %v1288_v25 = vpop.eup %1287  ;;  %1299 = vpow2.f32 %v726_v23  ;;  %892 = vmatpush.bf16.msra.mxu3 %v883_v57 }
 0x1de   : > { %v1290_v26 = vpop.eup %1289  ;;  %1301 = vpow2.f32 %v728_v24 }
 0x1df   : > { %v1292_v27 = vpop.eup %1291  ;;  %v738_v28 = vrot.slane %v1290_v26, 7 }
 0x1e0   : > { %v1294_v29 = vpop.eup %1293  ;;  %v740_v30 = vrot.slane %v1292_v27, 6 }
 0x1e1   : > { %v1296_v31 = vpop.eup %1295  ;;  %v739_v32 = vsel %vm665_vm1, %v738_v28, %v1288_v25  ;;  %v742_v33 = vrot.slane %v1294_v29, 5 }
 0x1e2   : > { %v1298_v34 = vpop.eup %1297  ;;  %v741_v35 = vsel %vm668_vm2, %v740_v30, %v739_v32  ;;  %v744_v36 = vrot.slane %v1296_v31, 4 }
 0x1e3   : > { %v1300_v37 = vpop.eup %1299  ;;  %v743_v38 = vsel %vm671_vm3, %v742_v33, %v741_v35  ;;  %v746_v39 = vrot.slane %v1298_v34, 3 }
 0x1e4   : > { %v1302_v40 = vpop.eup %1301  ;;  %v745_v41 = vsel %vm674_vm4, %v744_v36, %v743_v38  ;;  %v748_v42 = vrot.slane %v1300_v37, 2 }
 0x1e5   : > { %v747_v43 = vsel %vm677_vm5, %v746_v39, %v745_v41  ;;  %v750_v44 = vrot.slane %v1302_v40, 1 }
 0x1e6   : > { %v749_v45 = vsel %vm680_vm6, %v748_v42, %v747_v43 }
 0x1e7   : > { %v751_v46 = vsel %vm683_vm7, %v750_v44, %v749_v45 }
 0x1e8   : > { %v753_v47 = vsel %vm686_vm8, %v751_v46, 0.0 }
 0x1e9   : > { %754 = vadd.xlane.f32.xlu0 %v753_v47 }
 0x25c   : > { %v755_v60 = vpop.xlane.xlu0 %754 }
 0x25d   : > { %1303 = vrcp.f32 %v755_v60 }
 0x263   : > { %v1304_v62 = vpop.eup %1303 }
 0x264   : > { %v773_v2 = vmul.f32 %v1304_v62, %v1288_v25  ;;  %v758_v3 = vrot.slane %v1304_v62, 1  ;;  %v759_v4 = vrot.slane %v1304_v62, 2  ;;  %v760_v5 = vrot.slane %v1304_v62, 3 }
 0x265   : > { %v761_v7 = vrot.slane %v1304_v62, 4  ;;  %v762_v8 = vrot.slane %v1304_v62, 5  ;;  %v763_v9 = vrot.slane %v1304_v62, 6  ;;  %v764_v10 = vrot.slane %v1304_v62, 7 }
 0x266   : > { %v805_v11 = vpack.c.bf16 %v773_v2, %v773_v2  ;;  %v774_v12 = vmul.f32 %v1290_v26, %v758_v3  ;;  %v775_v13 = vmul.f32 %v1292_v27, %v759_v4  ;;  %v776_v14 = vmul.f32 %v1294_v29, %v760_v5 }
 0x267   : > { %v777_v15 = vmul.f32 %v1296_v31, %v761_v7  ;;  %v778_v16 = vmul.f32 %v1298_v34, %v762_v8  ;;  %v779_v22 = vmul.f32 %v1300_v37, %v763_v9  ;;  %v780_v25 = vmul.f32 %v1302_v40, %v764_v10 }
 0x268   : > { %1229 = vmatmul.msk.bf16.vlgmr.msrb.gmra.mxu3 %vm686_vm8, %v805_v11  ;;  %v789_v18 = vrot.slane %v774_v12, 7  ;;  %v806_v19 = vpack.c.bf16 %v774_v12, %v774_v12  ;;  %v791_v20 = vrot.slane %v775_v13, 6  ;;  %v807_v21 = vpack.c.bf16 %v775_v13, %v775_v13 }
 0x269   : > { %949 = vmatpush.bf16.msrb.mxu3 %v940_v63  ;;  %v793_v24 = vrot.slane %v776_v14, 5  ;;  %v795_v27 = vrot.slane %v777_v15, 4  ;;  %v797_v29 = vrot.slane %v778_v16, 3  ;;  %v799_v31 = vrot.slane %v779_v22, 2 }
 0x26a   : > { %v790_v23 = vsel %vm665_vm1, %v789_v18, %v773_v2  ;;  %1230 = vmatmul.msk.bf16.vlgmr.msra.gmra.mxu1 %vm686_vm8, %v806_v19  ;;  %1231 = vmatmul.msk.bf16.vlgmr.msrb.gmra.mxu2 %vm686_vm8, %v807_v21  ;;  %v801_v33 = vrot.slane %v780_v25, 1  ;;  %v808_v35 = vpack.c.bf16 %v776_v14, %v776_v14  ;;  %v809_v36 = vpack.c.bf16 %v777_v15, %v777_v15 }
 0x26b   : > { %v792_v26 = vsel %vm668_vm2, %v791_v20, %v790_v23  ;;  %968 = vmatpush.bf16.msra.mxu1 %v959_v17  ;;  %1022 = vmatpush.bf16.msrb.mxu2 %v1452_v0  ;;  %v810_v37 = vpack.c.bf16 %v778_v16, %v778_v16  ;;  %v811_v38 = vpack.c.bf16 %v779_v22, %v779_v22 }
 0x26c   : > { %v794_v28 = vsel %vm671_vm3, %v793_v24, %v792_v26  ;;  %v812_v39 = vpack.c.bf16 %v780_v25, %v780_v25 }
 0x26d   : > { %v796_v30 = vsel %vm674_vm4, %v795_v27, %v794_v28 }
 0x26e   : > { %v798_v32 = vsel %vm677_vm5, %v797_v29, %v796_v30 }
 0x26f   : > { %v800_v34 = vsel %vm680_vm6, %v799_v31, %v798_v32  ;;  %1023 = vmatpush.bf16.msrb.mxu2 %v1461_v1 }
 0x270   : > { %v802_v0 = vsel %vm683_vm7, %v801_v33, %v800_v34 }
 0x271   : > { %804 = vst.msk [vmem:[%s318_s18] sm:$0xff] %vm686_vm8, %v802_v0 }
 0x278   : > { %1232 = vmatmul.msk.bf16.vlgmr.msra.gmra.mxu3 %vm686_vm8, %v808_v35 }
 0x27a   : > { %1233 = vmatmul.msk.bf16.vlgmr.msrb.gmra.mxu1 %vm686_vm8, %v809_v36  ;;  %1234 = vmatmul.msk.bf16.vlgmr.msra.gmra.mxu2 %vm686_vm8, %v810_v37 }
 0x288   : > { %1235 = vmatmul.msk.bf16.vlgmr.msrb.gmra.mxu3 %vm686_vm8, %v811_v38 }
 0x28a   : > { %1236 = vmatmul.msk.bf16.vlgmr.msra.gmra.mxu1 %vm686_vm8, %v812_v39 }
 0x2e7   : > { %v856_v1 = vpop.f32.mrf.mxu1 }
 0x2e8   : > { %v975_v49 = vpack.c.bf16 %v856_v1, %v856_v1 }
 0x2ea   : > { %v991_v54 = vunpack.c.l.b16 %v975_v49 }
 0x2eb   : > { %v837_v40 = vpop.f32.mrf.mxu3 }
 0x2ec   : > { %v974_v52 = vpack.c.bf16 %v837_v40, %v837_v40  ;;  %v998_v62 = vrot.slane %v991_v54, 7 }
 0x2ed   : > { %v875_v41 = vpop.f32.mrf.mxu2 }
 0x2ee   : > { %v976_v48 = vpack.c.bf16 %v875_v41, %v875_v41  ;;  %v990_v58 = vunpack.c.l.b16 %v974_v52 }
 0x2ef   : > { %v858_v42 = vpop.f32.mrf.mxu1 }
 0x2f0   : > { %v992_v53 = vunpack.c.l.b16 %v976_v48  ;;  %v999_v4 = vsel %vm665_vm1, %v998_v62, %v990_v58 }
 0x2f2   : > { %v1000_v61 = vrot.slane %v992_v53, 6 }
 0x2f3   : > { %v839_v43 = vpop.f32.mrf.mxu3 }
 0x2f4   : > { %v1001_v7 = vsel %vm668_vm2, %v1000_v61, %v999_v4 }
 0x2f5   : > { %v877_v44 = vpop.f32.mrf.mxu2 }
 0x2f7   : > { %v913_v45 = vpop.f32.mrf.mxu1 }
 0x2f8   : > { %v978_v57 = vpack.c.bf16 %v913_v45, %v913_v45 }
 0x2fa   : > { %v994_v3 = vunpack.c.l.b16 %v978_v57 }
 0x2fb   : > { %v894_v46 = vpop.f32.mrf.mxu3 }
 0x2fc   : > { %v977_v50 = vpack.c.bf16 %v894_v46, %v894_v46  ;;  %v1004_v10 = vrot.slane %v994_v3, 4 }
 0x2fd   : > { %v932_v47 = vpop.f32.mrf.mxu2 }
 0x2fe   : > { %v993_v55 = vunpack.c.l.b16 %v977_v50  ;;  %v979_v59 = vpack.c.bf16 %v932_v47, %v932_v47 }
 0x2ff   : > { %v915_v51 = vpop.f32.mrf.mxu1 }
 0x300   : > { %v1002_v63 = vrot.slane %v993_v55, 5  ;;  %v995_v5 = vunpack.c.l.b16 %v979_v59 }
 0x302   : > { %v1003_v8 = vsel %vm671_vm3, %v1002_v63, %v1001_v7  ;;  %v1006_v12 = vrot.slane %v995_v5, 3 }
 0x303   : > { %v896_v56 = vpop.f32.mrf.mxu3  ;;  %v1005_v14 = vsel %vm674_vm4, %v1004_v10, %v1003_v8 }
 0x304   : > { %v1007_v18 = vsel %vm677_vm5, %v1006_v12, %v1005_v14 }
 0x305   : > { %v934_v60 = vpop.f32.mrf.mxu2 }
 0x307   : > { %v970_v2 = vpop.f32.mrf.mxu1 }
 0x308   : > { %v981_v6 = vpack.c.bf16 %v970_v2, %v970_v2 }
 0x30a   : > { %v997_v13 = vunpack.c.l.b16 %v981_v6 }
 0x30b   : > { %v951_v9 = vpop.f32.mrf.mxu3 }
 0x30c   : > { %v980_v11 = vpack.c.bf16 %v951_v9, %v951_v9  ;;  %v1010_v19 = vrot.slane %v997_v13, 1 }
 0x30e   : > { %v996_v15 = vunpack.c.l.b16 %v980_v11 }
 0x30f   : > { %v972_v16 = vpop.f32.mrf.mxu1 }
 0x310   : > { %v1008_v17 = vrot.slane %v996_v15, 2 }
 0x312   : > { %v1009_v20 = vsel %vm680_vm6, %v1008_v17, %v1007_v18 }
 0x313   : > { %v1011_v21 = vsel %vm683_vm7, %v1010_v19, %v1009_v20  ;;  %v953_v22 = vpop.f32.mrf.mxu3 }
 0x314   : > { %v1012_v23 = vpack.c.b16 %v1011_v21, %v1011_v21 }
 0x316   : > { %1237 = vmatmul.msk.bf16.vlgmr.msrb.gmra.mxu2 %vm364_vm0, %v1012_v23 }
 0x399   : > { %v1025_v24 = vpop.f32.mrf.mxu2 }
 0x39a   : > { %1029 = vst.msk [vmem:[%s288_s29] sm:$0xff] %vm364_vm0, %v1025_v24 }
 0x39b   : > { %1332 = shalt.err (!%p1329_p4)
}
 0x39c   : > { %1248 = dma.vmem_to_hbm [thread:$0]  (%p1439_p5), %s1048_s9, 128, %s1050_s10, %s1031_s12  }
 0x3a1   : > { %v1027_v25 = vpop.f32.mrf.mxu2 }
 0x3a2 PF: > { %p1254_p7 = scmp.ge.s32.totalorder %s1367_s24, 2  ;;  %s1064_s25 = sand.u32 1, %s1355_s21  }
 0x3a3   : > { %s1065_s19 = scalar_lea.sflag [#allocation3], %s1064_s25 }
 0x3a4   : > { %p1251_p8 = pnand %p1254_p7, %p1443_p6 }
 0x3a6   : > { %p1252_p9 = pneg %p1251_p8 }
 0x3a8   : > { %1350 = dma.done.wait (%p1252_p9), %s1065_s19, 128  }
 0x3a9   : > { %1352 = vsyncadd (%p1252_p9), %s1065_s19, 4294967168  ;;  %p17_p10 = scmp.ge.s32.totalorder %s1427_s27, 4   ;;  %s1610_s21 = smov %s1359_s22 }
 0x3aa   : > { %s1611_s22 = smov %s1363_s23  ;;  %s1612_s23 = smov %s1437_s30 }
 0x3ab   : > { %s1613_s24 = smov %s1427_s27  ;;  %19 = sbr.rel (!%p17_p10) target bundleno = 3 (0x3), region = 96 }
 0x3b0   :  { %1078 = vsyncpa [#allocation3], 1 }
 0x3b1   :  { %1080 = vsyncpa [#allocation3 + $0x1], 1 }

</bundles_post_ra>
